<compile_context>
chip_gen: v5e
topology: v5e:2x2
jax: 0.10.0
libtpu: 0.0.40
codegen_flags: <defaults>
</compile_context>

<pallas_src>
import functools

import jax
import jax.numpy as jnp
from jax.experimental import pallas as pl
from jax.experimental.pallas import tpu as pltpu


def mlp_kernel(x_ref, w1_ref, b1_ref, w2_ref, b2_ref, o_ref):
    # x_ref : (TB, D)    input tile
    # w1_ref: (D, H)     first-layer weight (already transposed to (in, out))
    # b1_ref: (1, H)     first-layer bias
    # w2_ref: (1, H)     second-layer weight (torch layout (out=1, in=H))
    # b2_ref: (1, 1)     second-layer bias
    # o_ref : (TB, 1)    output tile
    x = x_ref[...].astype(jnp.float32)                       # x.float()
    h = jnp.dot(x, w1_ref[...], preferred_element_type=jnp.float32)
    h = h + b1_ref[...]                                      # (TB, H)
    # Second layer: (TB, H) x (H,) -> (TB, 1) as multiply + lane reduction.
    y = jnp.sum(h * w2_ref[...], axis=-1, keepdims=True) + b2_ref[...]
    o_ref[...] = y.astype(o_ref.dtype)


def _pick_batch_tile(batch):
    """Largest tile (multiple of 8) that divides the batch, else the full batch."""
    for tb in (1024, 512, 256, 128, 64, 32, 16, 8):
        if batch % tb == 0:
            return tb
    return batch


@functools.partial(jax.jit, static_argnames=())
def mlp_forward(x, w1, b1, w2, b2):
    """Pallas MLP forward.

    x : (B, D)   input
    w1: (H, D)   l1.weight (torch layout (out, in)), H = 32
    b1: (H,)     l1.bias
    w2: (1, H)   l2.weight
    b2: (1,)     l2.bias
    returns (B, 1) float32
    """
    B, D = x.shape
    H = w1.shape[0]

    w1_t = jnp.transpose(w1).astype(jnp.float32)      # (D, H), one-time param reshape
    b1_2d = b1.reshape(1, H).astype(jnp.float32)      # (1, H)
    w2_2d = w2.reshape(1, H).astype(jnp.float32)      # (1, H)
    b2_2d = b2.reshape(1, 1).astype(jnp.float32)      # (1, 1)

    tb = _pick_batch_tile(B)
    grid = (pl.cdiv(B, tb),)

    return pl.pallas_call(
        mlp_kernel,
        out_shape=jax.ShapeDtypeStruct((B, 1), jnp.float32),
        grid=grid,
        in_specs=[
            pl.BlockSpec((tb, D), lambda i: (i, 0)),   # x: tiled over batch
            pl.BlockSpec((D, H), lambda i: (0, 0)),    # w1^T: VMEM-resident
            pl.BlockSpec((1, H), lambda i: (0, 0)),    # b1:  VMEM-resident
            pl.BlockSpec((1, H), lambda i: (0, 0)),    # w2:  VMEM-resident
            pl.BlockSpec((1, 1), lambda i: (0, 0)),    # b2:  VMEM-resident
        ],
        out_specs=pl.BlockSpec((tb, 1), lambda i: (i, 0)),
        compiler_params=pltpu.CompilerParams(
            dimension_semantics=("parallel",),         # megacore shard on v7x
        ),
    )(x, w1_t, b1_2d, w2_2d, b2_2d)


def mlp_ref(x, w1, b1, w2, b2):
    """Pure-JAX reference mirroring the PyTorch forward exactly."""
    x = x.astype(jnp.float32)
    h = x @ w1.T + b1
    return h @ w2.T + b2


if __name__ == "__main__":
    key = jax.random.PRNGKey(0)
    kx, kw1, kb1, kw2, kb2 = jax.random.split(key, 5)

    B, D, H = 16, 16, 32          # batch, input_size, hidden (module fixes H=32, out=1)
    x = jax.random.normal(kx, (B, D), dtype=jnp.float32)
    # torch.nn.Linear-style parameters (uniform init range is irrelevant for the check)
    w1 = jax.random.normal(kw1, (H, D), dtype=jnp.float32) * 0.1   # l1.weight (out, in)
    b1 = jax.random.normal(kb1, (H,), dtype=jnp.float32) * 0.1     # l1.bias
    w2 = jax.random.normal(kw2, (1, H), dtype=jnp.float32) * 0.1   # l2.weight
    b2 = jax.random.normal(kb2, (1,), dtype=jnp.float32) * 0.1     # l2.bias

    y = mlp_forward(x, w1, b1, w2, b2)
    jax.block_until_ready(y)

    y_ref = mlp_ref(x, w1, b1, w2, b2)
    assert y.shape == (B, 1)
    assert jnp.allclose(y, y_ref, atol=1e-5, rtol=1e-5)

    print("KERNEL_OK")
</pallas_src>

<mosaic_0001>
module attributes {stable_mosaic.version = 11 : i64} {
  func.func @mlp_kernel(%arg0: i32, %arg1: memref<16x16xf32, #tpu.memory_space<vmem>>, %arg2: memref<16x32xf32, #tpu.memory_space<vmem>>, %arg3: memref<1x32xf32, #tpu.memory_space<vmem>>, %arg4: memref<1x32xf32, #tpu.memory_space<vmem>>, %arg5: memref<1x1xf32, #tpu.memory_space<vmem>>, %arg6: memref<16x1xf32, #tpu.memory_space<vmem>>) attributes {dimension_semantics = [#tpu.dimension_semantics<parallel>], iteration_bounds = array<i64: 1>, scalar_prefetch = 0 : i64, scratch_operands = 0 : i64, tpu.core_type = #tpu.core_type<tc>, window_params = [{transform_indices = @transform_0, window_bounds = array<i64: 16, 16>}, {pipeline_mode = #tpu.pipeline_mode<synchronous>, transform_indices = @transform_1, window_bounds = array<i64: 16, 32>}, {pipeline_mode = #tpu.pipeline_mode<synchronous>, transform_indices = @transform_2, window_bounds = array<i64: 1, 32>}, {pipeline_mode = #tpu.pipeline_mode<synchronous>, transform_indices = @transform_3, window_bounds = array<i64: 1, 32>}, {pipeline_mode = #tpu.pipeline_mode<synchronous>, transform_indices = @transform_4, window_bounds = array<i64: 1, 1>}, {transform_indices = @transform_5, window_bounds = array<i64: 16, 1>}]} {
    %c0 = arith.constant 0 : index
    %c0_0 = arith.constant 0 : index
    %0 = vector.load %arg1[%c0, %c0_0] : memref<16x16xf32, #tpu.memory_space<vmem>>, vector<16x16xf32>
    %c0_1 = arith.constant 0 : index
    %c0_2 = arith.constant 0 : index
    %1 = vector.load %arg2[%c0_1, %c0_2] : memref<16x32xf32, #tpu.memory_space<vmem>>, vector<16x32xf32>
    %cst = arith.constant dense<0.000000e+00> : vector<16x32xf32>
    %2 = tpu.matmul %0, %1, %cst {dimension_numbers = #tpu.dot_dimension_numbers<[1], [0], [0], [1], [0, 0, 1, 1], [], []>} : vector<16x16xf32>, vector<16x32xf32>, vector<16x32xf32> -> vector<16x32xf32>
    %c0_3 = arith.constant 0 : index
    %c0_4 = arith.constant 0 : index
    %3 = vector.load %arg3[%c0_3, %c0_4] : memref<1x32xf32, #tpu.memory_space<vmem>>, vector<1x32xf32>
    %4 = vector.broadcast %3 : vector<1x32xf32> to vector<16x32xf32>
    %5 = arith.addf %2, %4 : vector<16x32xf32>
    %c0_5 = arith.constant 0 : index
    %c0_6 = arith.constant 0 : index
    %6 = vector.load %arg4[%c0_5, %c0_6] : memref<1x32xf32, #tpu.memory_space<vmem>>, vector<1x32xf32>
    %7 = vector.broadcast %6 : vector<1x32xf32> to vector<16x32xf32>
    %8 = arith.mulf %5, %7 : vector<16x32xf32>
    %cst_7 = arith.constant dense<0.000000e+00> : vector<16xf32>
    %9 = vector.multi_reduction <add>, %8, %cst_7 [1] : vector<16x32xf32> to vector<16xf32>
    %10 = vector.shape_cast %9 : vector<16xf32> to vector<16x1xf32>
    %c0_8 = arith.constant 0 : index
    %c0_9 = arith.constant 0 : index
    %11 = vector.load %arg5[%c0_8, %c0_9] : memref<1x1xf32, #tpu.memory_space<vmem>>, vector<1x1xf32>
    %12 = vector.broadcast %11 : vector<1x1xf32> to vector<16x1xf32>
    %13 = arith.addf %10, %12 : vector<16x1xf32>
    %c0_10 = arith.constant 0 : index
    %c0_11 = arith.constant 0 : index
    %14 = vector.load %arg6[%c0_10, %c0_11] : memref<16x1xf32, #tpu.memory_space<vmem>>, vector<16x1xf32>
    tpu.vector_store %arg6[%c0_10, %c0_11], %13 {strides = array<i32>} : memref<16x1xf32, #tpu.memory_space<vmem>>, vector<16x1xf32>,
    return
  }
  func.func @transform_0(%arg0: i32) -> (i32, i32) {
    %c0_i32 = arith.constant 0 : i32
    %c0_i32_0 = arith.constant 0 : i32
    return %arg0, %c0_i32 : i32, i32
  }
  func.func @transform_1(%arg0: i32) -> (i32, i32) {
    %c0_i32 = arith.constant 0 : i32
    %c0_i32_0 = arith.constant 0 : i32
    %c0_i32_1 = arith.constant 0 : i32
    return %c0_i32, %c0_i32_0 : i32, i32
  }
  func.func @transform_2(%arg0: i32) -> (i32, i32) {
    %c0_i32 = arith.constant 0 : i32
    %c0_i32_0 = arith.constant 0 : i32
    %c0_i32_1 = arith.constant 0 : i32
    return %c0_i32, %c0_i32_0 : i32, i32
  }
  func.func @transform_3(%arg0: i32) -> (i32, i32) {
    %c0_i32 = arith.constant 0 : i32
    %c0_i32_0 = arith.constant 0 : i32
    %c0_i32_1 = arith.constant 0 : i32
    return %c0_i32, %c0_i32_0 : i32, i32
  }
  func.func @transform_4(%arg0: i32) -> (i32, i32) {
    %c0_i32 = arith.constant 0 : i32
    %c0_i32_0 = arith.constant 0 : i32
    %c0_i32_1 = arith.constant 0 : i32
    return %c0_i32, %c0_i32_0 : i32, i32
  }
  func.func @transform_5(%arg0: i32) -> (i32, i32) {
    %c0_i32 = arith.constant 0 : i32
    %c0_i32_0 = arith.constant 0 : i32
    return %arg0, %c0_i32 : i32, i32
  }
}

</mosaic_0001>

<bundles_post_ra>
// kernel: mlp_forward.1
= control target key start
LH: loop header
LB: loop body
LE: loop exit
PB: predicated region body
PF: predicated region fallthrough
CT: control target
= control target key end

     0   :  { %s238_s0 = inlined_call_operand.hbm [shape: f32[16,16], index: 0, kind: input, shape index: {}]   ;;  %s239_s1 = inlined_call_operand.hbm [shape: f32[16,32], index: 1, kind: input, shape index: {}]   ;;  %s240_s2 = inlined_call_operand.vmem [shape: f32[1,32], index: 2, kind: input, shape index: {}]   ;;  %s241_s3 = inlined_call_operand.vmem [shape: f32[1,32], index: 3, kind: input, shape index: {}]   ;;  %s242_s4 = inlined_call_operand.<no memory space> [shape: f32[1,1], index: 4, kind: input, shape index: {}]   ;;  %s243_s5 = inlined_call_operand.vmem [shape: f32[16,1], index: 5, kind: output, shape index: {}]  }
   0x1   :  { %v10_v0 = vstv %s242_s4 }
   0x2   :  { %11 = vst [vmem:[#allocation2] sm:$0x1] %v10_v0 }
   0x3   :  { %12 = vsyncpa [#allocation4], 0  ;;  %s18_s22 = sshll.u32 %s238_s0, 4  ;;  %s19_s22 = int_to_ptr.hbm [resolvable:$true] %s18_s22 }
   0x4   :  { %13 = vsyncpa [#allocation6], 0  ;;  %s183_s23 = smov [#allocation3]   ;;  %s31_s27 = sshll.u32 %s239_s1, 4  ;;  %s32_s27 = int_to_ptr.hbm [resolvable:$true] %s31_s27 }
   0x5   :  { %s20_s24 = sshll.u32 %s183_s23, 4  ;;  %s184_s28 = smov 128   ;;  %s21_s24 = int_to_ptr.vmem [resolvable:$true] %s20_s24 }
   0x6   :  { %s185_s29 = smov 8   ;;  %s186_s4 = smov [#allocation5]  }
   0x7   :  { %26 = dma.hbm_to_vmem [thread:$0]  %s19_s22, 256, %s21_s24, [#allocation4], %s184_s28, %s184_s28, %s185_s29  }
   0x8   :  { %s33_s30 = sshll.u32 %s186_s4, 4  ;;  %s34_s30 = int_to_ptr.vmem [resolvable:$true] %s33_s30 }
   0x9   :  { %39 = dma.hbm_to_vmem [thread:$0]  %s32_s27, 256, %s34_s30, [#allocation6], %s184_s28, %s184_s28, %s185_s29  }
   0xa   :  { %179 = dma.done.wait [#allocation4], 256  }
   0xb   :  { %180 = vsyncadd [#allocation4], 4294967040 }
   0xc   :  { %181 = dma.done.wait [#allocation6], 256  }
   0xd   :  { %182 = vsyncadd [#allocation6], 4294967040  ;;  %v57_v1 = vld [vmem:[#allocation5 + $0x8] sm:$0xff]  ;;  %v56_v2 = vld [vmem:[#allocation5] sm:$0xff]  ;;  %vm62_vm0 = vcmask 130048   ;;  %vm98_vm1 = vcmask 261120  }
   0xe   :  { %83 = vmatpush.msra.mxu0 %v57_v1  ;;  %v54_v3 = vld [vmem:[#allocation3] sm:$0xff]  ;;  %122 = vmatpush.msra.mxu1 %v57_v1  ;;  %v55_v4 = vld [vmem:[#allocation3 + $0x8] sm:$0xff]  ;;  %v128_v5 = vld [vmem:[%s240_s2] ss:$0 sm:$0xff]  ;;  %vm111_vm2 = vcmask 7168  }
   0xf   :  { %v129_v6 = vld [vmem:[%s241_s3] ss:$0 sm:$0xff] }
  0x10   :  { %84 = vmatpush.msra.mxu0 %v56_v2  ;;  %123 = vmatpush.msra.mxu1 %v56_v2  ;;  %v130_v15 = vld [vmem:[#allocation2] ss:$0 sm:$0xff] }
  0x11   :  { %120 = vmatmul.msk.f32.vlgmr.msra.gmra.mxu0 %vm62_vm0, %v54_v3  ;;  %121 = vmatmul.msk.f32.vlgmr.msra.gmra.mxu1 %vm62_vm0, %v55_v4 }
  0x8e   :  { %v86_v7 = vpop.f32.mrf.mxu0  ;;  %v89_v8 = vpop.f32.mrf.mxu1 }
  0x8f   :  { %v87_v9 = vadd.f32 %v128_v5, %v86_v7  ;;  %v90_v11 = vadd.f32 %v128_v5, %v89_v8 }
  0x91   :  { %v96_v10 = vmul.f32 %v129_v6, %v87_v9  ;;  %v97_v13 = vmul.f32 %v129_v6, %v90_v11 }
  0x93   :  { %v99_v12 = vsel %vm98_vm1, %v96_v10, 0.0  ;;  %v102_v14 = vsel %vm98_vm1, %v97_v13, 0.0 }
  0x94   :  { %100 = vadd.xlane.f32.xlu0 %v99_v12 }
  0x9c   :  { %103 = vadd.xlane.f32.xlu0 %v102_v14 }
 0x107   :  { %v101_v16 = vpop.xlane.xlu0 %100 }
 0x108   :  { %v109_v17 = vadd.f32 %v130_v15, %v101_v16 }
 0x10a   :  { %112 = vst.msk [vmem:[%s243_s5] sm:$0xff] %vm111_vm2, %v109_v17 }
 0x10f   :  { %v104_v18 = vpop.xlane.xlu0 %103 }
 0x110   :  { %v110_v19 = vadd.f32 %v130_v15, %v104_v18 }
 0x112   :  { %113 = vst.msk [vmem:[%s243_s5 + $0x8] sm:$0xff] %vm111_vm2, %v110_v19 }
 0x113   :  { %118 = vsyncpa [#allocation4], 1 }
 0x114   :  { %119 = vsyncpa [#allocation6], 1 }

</bundles_post_ra>
